<compile_context>
chip_gen: v7x
topology: tpu7x:2x2x1
jax: 0.10.0
libtpu: 0.0.40
codegen_flags: <defaults>
</compile_context>

<pallas_src>
import jax
import jax.numpy as jnp
from jax.experimental import pallas as pl
from jax.experimental.pallas import tpu as pltpu

_LANE = 128
_ROW_ALIGN = 16  # bf16 packs 16 rows per vreg sublane group


def _round_up(n, m):
    return ((n + m - 1) // m) * m


# --------------------------------------------------------------------------- #
# Kernel
# --------------------------------------------------------------------------- #
def _make_mlp_kernel(num_layers, compute_dtype):
    def kernel(alpha_ref, x_ref, *refs):
        # refs = (w1, b1, w2, b2, ..., wL, bL, o_ref)
        o_ref = refs[-1]
        h = x_ref[...]  # bf16 tile
        for l in range(num_layers):
            w_ref = refs[2 * l]
            b_ref = refs[2 * l + 1]
            # MXU: bf16 operands, f32 accumulation.
            y = jnp.dot(h, w_ref[...], preferred_element_type=jnp.float32)
            # f32 epilogue: bias broadcast over rows + shared-slope PReLU.
            y = y + b_ref[...]
            a = alpha_ref[l]
            y = jnp.where(y > 0, y, a * y)
            # TODO(synk): stochastic dropout (p > 0) would need pltpu.prng_* masking;
            # the module default p=0.0 is identity and is elided here.
            if l + 1 < num_layers:
                h = y.astype(compute_dtype)  # only a bf16 activation stays live
            else:
                h = y  # keep final layer in f32 until the output cast
        o_ref[...] = h.astype(o_ref.dtype)

    return kernel


# --------------------------------------------------------------------------- #
# One-time parameter preparation (hoisted out of the per-call path)
# --------------------------------------------------------------------------- #
def prepare_mlp_params(params, *, compute_dtype=jnp.bfloat16, lane_align=_LANE):
    """Pad weights/biases once. params = [(W_t (in,out), b (1,out), alpha (1,1))]*L.

    Zero-padding feature dims to lane multiples is mathematically exact:
    zero input cols x zero weight rows/cols stay zero through matmul, and
    PReLU(0) = 0 keeps padded columns zero layer to layer.
    """
    num_layers = len(params)
    dims = [params[0][0].shape[0]] + [w.shape[1] for (w, _, _) in params]
    pdims = [_round_up(d, lane_align) for d in dims]
    # NOTE: on v6e/v7x (2x256^2 MXU) aligning large hidden dims to 256 feeds the
    # full systolic array; 128 keeps padded HBM/VMEM bytes minimal for small dims.

    alphas = jnp.concatenate(
        [a.reshape(1) for (_, _, a) in params]).astype(jnp.float32)  # (L,), SMEM

    layers = []
    for l, (w_t, bias, _) in enumerate(params):
        din, dout = pdims[l], pdims[l + 1]
        w_pad = jnp.zeros((din, dout), compute_dtype)
        w_pad = w_pad.at[:w_t.shape[0], :w_t.shape[1]].set(w_t.astype(compute_dtype))
        b_pad = jnp.zeros((1, dout), jnp.float32)
        b_pad = b_pad.at[:, :bias.shape[1]].set(bias.astype(jnp.float32))
        layers.append((w_pad, b_pad))

    return dict(alphas=alphas, layers=layers, dims=dims, pdims=pdims,
                num_layers=num_layers, compute_dtype=compute_dtype)


def _vmem_capacity_bytes():
    """Generation-aware VMEM capacity (128 MiB v5e/v6e, 64 MiB v7x)."""
    try:
        info = pltpu.get_tpu_info()
        cap = getattr(info, "vmem_capacity_bytes", None)
        if cap:
            return int(cap)
    except Exception:  # pragma: no cover - defensive; fall back to tightest chip
        pass
    return 64 * 1024 * 1024


# --------------------------------------------------------------------------- #
# Forward
# --------------------------------------------------------------------------- #
def mlp_pallas(x, prepared, *, batch_tile=512, out_dtype=None,
               use_core_parallel=False):
    """Fused MLP forward. `prepared` comes from prepare_mlp_params()."""
    compute_dtype = prepared["compute_dtype"]
    pdims = prepared["pdims"]
    dims = prepared["dims"]
    layers = prepared["layers"]
    alphas = prepared["alphas"]
    num_layers = prepared["num_layers"]

    B, in_dim = x.shape
    assert in_dim == dims[0], f"expected input dim {dims[0]}, got {in_dim}"
    out_dim = dims[-1]
    out_dtype = x.dtype if out_dtype is None else out_dtype

    itemsize = jnp.dtype(compute_dtype).itemsize
    out_itemsize = jnp.dtype(out_dtype).itemsize

    # ---- VMEM budget (generation-aware) -------------------------------------
    vmem_cap = _vmem_capacity_bytes()
    # e.g. 96 MiB scoped limit on v5e/v6e (128 MiB phys), 48 MiB on v7x (64 MiB phys).
    vmem_limit = int(min(0.75 * vmem_cap, 100 * 1024 * 1024))
    vmem_budget = vmem_limit - 2 * 1024 * 1024  # slack for compiler internals

    weight_bytes = sum(w.size * itemsize for (w, _) in layers)
    bias_bytes = sum(b.size * 4 for (_, b) in layers)
    # Constant-index_map BlockSpecs are still double-buffered by the pipeline,
    # so the resident weights/biases really cost 2x.
    resident_bytes = 2 * (weight_bytes + bias_bytes)

    def vmem_est(tb_):
        io = 2 * (tb_ * pdims[0] * itemsize + tb_ * pdims[-1] * out_itemsize)
        act = 2 * tb_ * max(pdims) * 4  # f32 y + bf16 h headroom per layer
        return resident_bytes + io + act

    # ---- Batch tiling: 16-row aligned, budget-driven, evened across tiles ----
    B16 = _round_up(B, _ROW_ALIGN)
    tb = _round_up(min(batch_tile, B16), _ROW_ALIGN)
    while tb > _ROW_ALIGN and vmem_est(tb) > vmem_budget:
        tb = max(_ROW_ALIGN, _round_up(tb // 2, _ROW_ALIGN))
    if vmem_est(_ROW_ALIGN) > vmem_budget:
        # TODO(synk): stream weights with pltpu.emit_pipeline / tile the widest
        # layer's N with an accumulator when weights alone exceed the VMEM cap
        # (most relevant on v7x's 64 MiB VMEM).
        raise NotImplementedError(
            f"resident weights ({resident_bytes} B) exceed VMEM budget "
            f"({vmem_budget} B); weight streaming not implemented")
    n_tiles = pl.cdiv(B16, tb)
    tb = _round_up(pl.cdiv(B16, n_tiles), _ROW_ALIGN)  # even tiles, minimal pad waste
    b_pad = n_tiles * tb
    grid = (n_tiles,)

    # ---- Per-call input padding (fast path when already aligned) ------------
    if b_pad == B and pdims[0] == in_dim:
        x_pad = x.astype(compute_dtype)
    else:
        x_pad = jnp.zeros((b_pad, pdims[0]), compute_dtype)
        x_pad = x_pad.at[:B, :in_dim].set(x.astype(compute_dtype))

    flat_in = [alphas, x_pad]
    in_specs = [
        pl.BlockSpec(memory_space=pltpu.MemorySpace.SMEM),       # PReLU slopes
        pl.BlockSpec((tb, pdims[0]), lambda i: (i, 0)),          # x tile
    ]
    for l, (w_pad, b_arr) in enumerate(layers):
        din, dout = pdims[l], pdims[l + 1]
        flat_in.extend([w_pad, b_arr])
        # Constant index maps -> weights/biases stay resident in VMEM across the grid.
        in_specs.append(pl.BlockSpec((din, dout), lambda i: (0, 0)))
        in_specs.append(pl.BlockSpec((1, dout), lambda i: (0, 0)))

    out_specs = pl.BlockSpec((tb, pdims[-1]), lambda i: (i, 0))

    flops = 2 * b_pad * sum(pdims[l] * pdims[l + 1] for l in range(num_layers))
    bytes_accessed = (x_pad.size * itemsize + weight_bytes + bias_bytes
                      + b_pad * pdims[-1] * out_itemsize)
    cost = pl.CostEstimate(flops=flops, transcendentals=0,
                           bytes_accessed=bytes_accessed)

    # CORE_PARALLEL gives explicit 2-TensorCore sharding on v7x (verify in trace);
    # plain PARALLEL is the safe default on single-TC v5e/v6e.
    dim_sems = (pltpu.CORE_PARALLEL,) if use_core_parallel else (pltpu.PARALLEL,)

    out_pad = pl.pallas_call(
        _make_mlp_kernel(num_layers, compute_dtype),
        out_shape=jax.ShapeDtypeStruct((b_pad, pdims[-1]), out_dtype),
        grid=grid,
        in_specs=in_specs,
        out_specs=out_specs,
        compiler_params=pltpu.CompilerParams(
            dimension_semantics=dim_sems,
            vmem_limit_bytes=vmem_limit),
        cost_estimate=cost,
    )(*flat_in)

    return out_pad[:B, :out_dim]


# --------------------------------------------------------------------------- #
# Reference + parameter construction (mirrors the PyTorch module)
# --------------------------------------------------------------------------- #
def make_mlp_params(key, input_dim, output_dim, num_layers=3):
    """Mirrors MLP.__init__ + MLP.init(): all params ~ Uniform[0, 1)."""
    step_size = (input_dim - output_dim) // num_layers
    hidden_dims = [output_dim + i * step_size for i in reversed(range(num_layers))]

    params = []
    layer_indim = input_dim
    for hidden_dim in hidden_dims:
        key, kw, kb, ka = jax.random.split(key, 4)
        # PyTorch Linear weight is (out, in); we store it transposed as (in, out).
        w_t = jax.random.uniform(kw, (layer_indim, hidden_dim), dtype=jnp.float32)
        b = jax.random.uniform(kb, (1, hidden_dim), dtype=jnp.float32)
        alpha = jax.random.uniform(ka, (1, 1), dtype=jnp.float32)  # shared PReLU slope
        params.append((w_t, b, alpha))
        layer_indim = hidden_dim
    return params


def mlp_reference(x, params, compute_dtype=jnp.float32):
    """Pure-JAX reference; compute_dtype mirrors the kernel's matmul operand dtype."""
    h = x
    for (w_t, b, a) in params:
        y = jnp.dot(h.astype(compute_dtype), w_t.astype(compute_dtype),
                    preferred_element_type=jnp.float32) + b
        h = jnp.where(y > 0, y, a[0, 0] * y)
    return h


if __name__ == "__main__":
    key = jax.random.PRNGKey(0)
    k_x, k_p = jax.random.split(key)

    batch, input_dim, output_dim = 8, 32, 8  # hidden_dims -> [24, 16, 8]
    x = jax.random.normal(k_x, (batch, input_dim), dtype=jnp.float32)
    params = make_mlp_params(k_p, input_dim, output_dim, num_layers=3)

    prepared = prepare_mlp_params(params)          # one-time padding / bf16 cast
    out = jax.block_until_ready(mlp_pallas(x, prepared))
    assert out.shape == (batch, output_dim)

    # Apples-to-apples check (same bf16 matmul operands, f32 accumulation).
    ref_bf16 = mlp_reference(x, params, compute_dtype=jnp.bfloat16)
    assert jnp.allclose(out, ref_bf16, atol=1e-2, rtol=1e-2)

    # Looser check against the full-f32 PyTorch-equivalent semantics.
    ref_f32 = mlp_reference(x, params, compute_dtype=jnp.float32)
    assert jnp.allclose(out, ref_f32, atol=1.0, rtol=1e-1)

    print("KERNEL_OK")
</pallas_src>

<mosaic_0001>
module attributes {stable_mosaic.version = 11 : i64} {
  func.func @kernel(%arg0: i32, %arg1: memref<3xf32, #tpu.memory_space<smem>>, %arg2: memref<16x128xbf16, #tpu.memory_space<vmem>>, %arg3: memref<128x128xbf16, #tpu.memory_space<vmem>>, %arg4: memref<1x128xf32, #tpu.memory_space<vmem>>, %arg5: memref<128x128xbf16, #tpu.memory_space<vmem>>, %arg6: memref<1x128xf32, #tpu.memory_space<vmem>>, %arg7: memref<128x128xbf16, #tpu.memory_space<vmem>>, %arg8: memref<1x128xf32, #tpu.memory_space<vmem>>, %arg9: memref<16x128xf32, #tpu.memory_space<vmem>>) attributes {dimension_semantics = [#tpu.dimension_semantics<parallel>], iteration_bounds = array<i64: 1>, scalar_prefetch = 0 : i64, scratch_operands = 0 : i64, tpu.core_type = #tpu.core_type<tc>, window_params = [{transform_indices = @transform_0, window_bounds = array<i64: 3>}, {transform_indices = @transform_1, window_bounds = array<i64: 16, 128>}, {pipeline_mode = #tpu.pipeline_mode<synchronous>, transform_indices = @transform_2, window_bounds = array<i64: 128, 128>}, {pipeline_mode = #tpu.pipeline_mode<synchronous>, transform_indices = @transform_3, window_bounds = array<i64: 1, 128>}, {pipeline_mode = #tpu.pipeline_mode<synchronous>, transform_indices = @transform_4, window_bounds = array<i64: 128, 128>}, {pipeline_mode = #tpu.pipeline_mode<synchronous>, transform_indices = @transform_5, window_bounds = array<i64: 1, 128>}, {pipeline_mode = #tpu.pipeline_mode<synchronous>, transform_indices = @transform_6, window_bounds = array<i64: 128, 128>}, {pipeline_mode = #tpu.pipeline_mode<synchronous>, transform_indices = @transform_7, window_bounds = array<i64: 1, 128>}, {transform_indices = @transform_8, window_bounds = array<i64: 16, 128>}]} {
    %c0 = arith.constant 0 : index
    %c0_0 = arith.constant 0 : index
    %0 = vector.load %arg2[%c0, %c0_0] : memref<16x128xbf16, #tpu.memory_space<vmem>>, vector<16x128xbf16>
    %c0_1 = arith.constant 0 : index
    %c0_2 = arith.constant 0 : index
    %1 = vector.load %arg3[%c0_1, %c0_2] : memref<128x128xbf16, #tpu.memory_space<vmem>>, vector<128x128xbf16>
    %cst = arith.constant dense<0.000000e+00> : vector<16x128xf32>
    %2 = tpu.matmul %0, %1, %cst {dimension_numbers = #tpu.dot_dimension_numbers<[1], [0], [0], [1], [0, 0, 1, 1], [], []>} : vector<16x128xbf16>, vector<128x128xbf16>, vector<16x128xf32> -> vector<16x128xf32>
    %c0_3 = arith.constant 0 : index
    %c0_4 = arith.constant 0 : index
    %3 = vector.load %arg4[%c0_3, %c0_4] : memref<1x128xf32, #tpu.memory_space<vmem>>, vector<1x128xf32>
    %4 = vector.broadcast %3 : vector<1x128xf32> to vector<16x128xf32>
    %5 = arith.addf %2, %4 : vector<16x128xf32>
    %c0_5 = arith.constant 0 : index
    %6 = memref.load %arg1[%c0_5] : memref<3xf32, #tpu.memory_space<smem>>
    %cst_6 = arith.constant 0.000000e+00 : f32
    %7 = vector.broadcast %cst_6 : f32 to vector<16x128xf32>
    %8 = arith.cmpf ogt, %5, %7 : vector<16x128xf32>
    %9 = vector.broadcast %6 : f32 to vector<16x128xf32>
    %10 = arith.mulf %9, %5 : vector<16x128xf32>
    %11 = arith.select %8, %5, %10 : vector<16x128xi1>, vector<16x128xf32>
    %12 = arith.truncf %11 : vector<16x128xf32> to vector<16x128xbf16>
    %c0_7 = arith.constant 0 : index
    %c0_8 = arith.constant 0 : index
    %13 = vector.load %arg5[%c0_7, %c0_8] : memref<128x128xbf16, #tpu.memory_space<vmem>>, vector<128x128xbf16>
    %cst_9 = arith.constant dense<0.000000e+00> : vector<16x128xf32>
    %14 = tpu.matmul %12, %13, %cst_9 {dimension_numbers = #tpu.dot_dimension_numbers<[1], [0], [0], [1], [0, 0, 1, 1], [], []>} : vector<16x128xbf16>, vector<128x128xbf16>, vector<16x128xf32> -> vector<16x128xf32>
    %c0_10 = arith.constant 0 : index
    %c0_11 = arith.constant 0 : index
    %15 = vector.load %arg6[%c0_10, %c0_11] : memref<1x128xf32, #tpu.memory_space<vmem>>, vector<1x128xf32>
    %16 = vector.broadcast %15 : vector<1x128xf32> to vector<16x128xf32>
    %17 = arith.addf %14, %16 : vector<16x128xf32>
    %c1 = arith.constant 1 : index
    %18 = memref.load %arg1[%c1] : memref<3xf32, #tpu.memory_space<smem>>
    %cst_12 = arith.constant 0.000000e+00 : f32
    %19 = vector.broadcast %cst_12 : f32 to vector<16x128xf32>
    %20 = arith.cmpf ogt, %17, %19 : vector<16x128xf32>
    %21 = vector.broadcast %18 : f32 to vector<16x128xf32>
    %22 = arith.mulf %21, %17 : vector<16x128xf32>
    %23 = arith.select %20, %17, %22 : vector<16x128xi1>, vector<16x128xf32>
    %24 = arith.truncf %23 : vector<16x128xf32> to vector<16x128xbf16>
    %c0_13 = arith.constant 0 : index
    %c0_14 = arith.constant 0 : index
    %25 = vector.load %arg7[%c0_13, %c0_14] : memref<128x128xbf16, #tpu.memory_space<vmem>>, vector<128x128xbf16>
    %cst_15 = arith.constant dense<0.000000e+00> : vector<16x128xf32>
    %26 = tpu.matmul %24, %25, %cst_15 {dimension_numbers = #tpu.dot_dimension_numbers<[1], [0], [0], [1], [0, 0, 1, 1], [], []>} : vector<16x128xbf16>, vector<128x128xbf16>, vector<16x128xf32> -> vector<16x128xf32>
    %c0_16 = arith.constant 0 : index
    %c0_17 = arith.constant 0 : index
    %27 = vector.load %arg8[%c0_16, %c0_17] : memref<1x128xf32, #tpu.memory_space<vmem>>, vector<1x128xf32>
    %28 = vector.broadcast %27 : vector<1x128xf32> to vector<16x128xf32>
    %29 = arith.addf %26, %28 : vector<16x128xf32>
    %c2 = arith.constant 2 : index
    %30 = memref.load %arg1[%c2] : memref<3xf32, #tpu.memory_space<smem>>
    %cst_18 = arith.constant 0.000000e+00 : f32
    %31 = vector.broadcast %cst_18 : f32 to vector<16x128xf32>
    %32 = arith.cmpf ogt, %29, %31 : vector<16x128xf32>
    %33 = vector.broadcast %30 : f32 to vector<16x128xf32>
    %34 = arith.mulf %33, %29 : vector<16x128xf32>
    %35 = arith.select %32, %29, %34 : vector<16x128xi1>, vector<16x128xf32>
    %c0_19 = arith.constant 0 : index
    %c0_20 = arith.constant 0 : index
    %36 = vector.load %arg9[%c0_19, %c0_20] : memref<16x128xf32, #tpu.memory_space<vmem>>, vector<16x128xf32>
    tpu.vector_store %arg9[%c0_19, %c0_20], %35 {strides = array<i32>} : memref<16x128xf32, #tpu.memory_space<vmem>>, vector<16x128xf32>,
    return
  }
  func.func @transform_0(%arg0: i32) -> i32 {
    %c0_i32 = arith.constant 0 : i32
    %c0_i32_0 = arith.constant 0 : i32
    return %c0_i32 : i32
  }
  func.func @transform_1(%arg0: i32) -> (i32, i32) {
    %c0_i32 = arith.constant 0 : i32
    %c0_i32_0 = arith.constant 0 : i32
    return %arg0, %c0_i32 : i32, i32
  }
  func.func @transform_2(%arg0: i32) -> (i32, i32) {
    %c0_i32 = arith.constant 0 : i32
    %c0_i32_0 = arith.constant 0 : i32
    %c0_i32_1 = arith.constant 0 : i32
    return %c0_i32, %c0_i32_0 : i32, i32
  }
  func.func @transform_3(%arg0: i32) -> (i32, i32) {
    %c0_i32 = arith.constant 0 : i32
    %c0_i32_0 = arith.constant 0 : i32
    %c0_i32_1 = arith.constant 0 : i32
    return %c0_i32, %c0_i32_0 : i32, i32
  }
  func.func @transform_4(%arg0: i32) -> (i32, i32) {
    %c0_i32 = arith.constant 0 : i32
    %c0_i32_0 = arith.constant 0 : i32
    %c0_i32_1 = arith.constant 0 : i32
    return %c0_i32, %c0_i32_0 : i32, i32
  }
  func.func @transform_5(%arg0: i32) -> (i32, i32) {
    %c0_i32 = arith.constant 0 : i32
    %c0_i32_0 = arith.constant 0 : i32
    %c0_i32_1 = arith.constant 0 : i32
    return %c0_i32, %c0_i32_0 : i32, i32
  }
  func.func @transform_6(%arg0: i32) -> (i32, i32) {
    %c0_i32 = arith.constant 0 : i32
    %c0_i32_0 = arith.constant 0 : i32
    %c0_i32_1 = arith.constant 0 : i32
    return %c0_i32, %c0_i32_0 : i32, i32
  }
  func.func @transform_7(%arg0: i32) -> (i32, i32) {
    %c0_i32 = arith.constant 0 : i32
    %c0_i32_0 = arith.constant 0 : i32
    %c0_i32_1 = arith.constant 0 : i32
    return %c0_i32, %c0_i32_0 : i32, i32
  }
  func.func @transform_8(%arg0: i32) -> (i32, i32) {
    %c0_i32 = arith.constant 0 : i32
    %c0_i32_0 = arith.constant 0 : i32
    return %arg0, %c0_i32 : i32, i32
  }
}

</mosaic_0001>

<bundles_post_ra>
// kernel: tpu_custom_call.1
= control target key start
LH: loop header
LB: loop body
LE: loop exit
PB: predicated region body
PF: predicated region fallthrough
CT: control target
= control target key end

     0   :  { %13 = vsyncpa [#allocation5], 0  ;;  %s953_s0 = inlined_call_operand.hbm [shape: f32[3], index: 0, kind: input, shape index: {}]   ;;  %s954_s1 = inlined_call_operand.hbm [shape: bf16[16,128], index: 1, kind: input, shape index: {}]   ;;  %s955_s2 = inlined_call_operand.hbm [shape: bf16[128,128], index: 2, kind: input, shape index: {}]   ;;  %s956_s3 = inlined_call_operand.vmem [shape: f32[1,128], index: 3, kind: input, shape index: {}]   ;;  %s957_s4 = inlined_call_operand.hbm [shape: bf16[128,128], index: 4, kind: input, shape index: {}]   ;;  %s958_s5 = inlined_call_operand.vmem [shape: f32[1,128], index: 5, kind: input, shape index: {}]   ;;  %s959_s6 = inlined_call_operand.hbm [shape: bf16[128,128], index: 6, kind: input, shape index: {}]   ;;  %s960_s7 = inlined_call_operand.vmem [shape: f32[1,128], index: 7, kind: input, shape index: {}]   ;;  %s961_s8 = inlined_call_operand.hbm [shape: f32[16,128], index: 8, kind: output, shape index: {}]  }
   0x1   :  { %14 = vsyncpa [#allocation3], 0 }
   0x2   :  { %15 = vsyncpa [#allocation8], 0 }
   0x3   :  { %16 = vsyncpa [#allocation11], 0 }
   0x4   :  { %17 = vsyncpa [#allocation4], 0  ;;  %s773_s27 = smov [#allocation7]   ;;  %s774_s29 = smov [#allocation6]  }
   0x5   :  { %s43_s28 = sshll.u32 %s773_s27, 4  ;;  %s31_s30 = sshll.u32 %s774_s29, 4  ;;  %s44_s28 = int_to_ptr.vmem [resolvable:$true] %s43_s28  ;;  %s32_s30 = int_to_ptr.vmem [resolvable:$true] %s31_s30 }
   0x6   :  { %s643_s11 = scalar_lea.hbm %s955_s2, 1024 }
   0x7   :  { %p644_p0 = scmp.ne.s32.totalorder %s955_s2, %s643_s11  ;;  %p647_p1 = scmp.lt.u32.totalorder %s643_s11, %s955_s2 }
   0x9   :  { %p649_p2 = pnand %p647_p1, %p644_p0 }
   0xb   :  { %652 = shalt.err (!%p649_p2)
}
   0xc   :  { %s653_s16 = scalar_lea.vmem %s44_s28, 1024  ;;  %p658_p4 = scmp.lt.s32.totalorder %s44_s28, %s44_s28 }
   0xd   :  { %p654_p3 = scmp.ne.s32.totalorder %s44_s28, %s653_s16  ;;  %p659_p5 = scmp.lt.s32.totalorder %s653_s16, %s653_s16 }
   0xf   :  { %p660_p6 = por %p659_p5, %p658_p4 }
  0x11   :  { %p661_p7 = pnand %p660_p6, %p654_p3 }
  0x13   :  { %664 = shalt.err (!%p661_p7)
}
  0x14   :  { %s775_s17 = smov 64   ;;  %s776_s18 = smov 4  }
  0x15   :  { %49 = dma.hbm_to_vmem [thread:$0]  %s955_s2, 1024, %s44_s28, [#allocation8], %s775_s17, %s775_s17, %s776_s18  }
  0x16   :  { %s665_s23 = scalar_lea.hbm %s953_s0, 16 }
  0x17   :  { %p666_p8 = scmp.ne.s32.totalorder %s953_s0, %s665_s23  ;;  %p669_p9 = scmp.lt.u32.totalorder %s665_s23, %s953_s0 }
  0x19   :  { %p671_p10 = pnand %p669_p9, %p666_p8 }
  0x1b   :  { %674 = shalt.err (!%p671_p10)
}
  0x1c   :  { %s777_s29 = smov [#allocation2]   ;;  %s675_s11 = scalar_lea.hbm %s954_s1, 128 }
  0x1d   :  { %25 = dma.hbm_to_smem %s953_s0, 16, %s777_s29, [#allocation5]  }
  0x1e   :  { %p676_p11 = scmp.ne.s32.totalorder %s954_s1, %s675_s11  ;;  %p679_p12 = scmp.lt.u32.totalorder %s675_s11, %s954_s1 }
  0x20   :  { %p681_p13 = pnand %p679_p12, %p676_p11 }
  0x22   :  { %684 = shalt.err (!%p681_p13)
}
  0x23   :  { %s685_s16 = scalar_lea.vmem %s32_s30, 128  ;;  %p690_p1 = scmp.lt.s32.totalorder %s32_s30, %s32_s30 }
  0x24   :  { %p686_p0 = scmp.ne.s32.totalorder %s32_s30, %s685_s16  ;;  %p691_p2 = scmp.lt.s32.totalorder %s685_s16, %s685_s16 }
  0x26   :  { %p692_p3 = por %p691_p2, %p690_p1 }
  0x28   :  { %p693_p4 = pnand %p692_p3, %p686_p0 }
  0x2a   :  { %696 = shalt.err (!%p693_p4)
}
  0x2b   :  { %37 = dma.hbm_to_vmem [thread:$0]  %s954_s1, 128, %s32_s30, [#allocation3], %s775_s17, %s775_s17, %s776_s18  }
  0x2c   :  { %s778_s20 = smov [#allocation9]   ;;  %s779_s22 = smov [#allocation10]  }
  0x2d   :  { %s57_s21 = sshll.u32 %s778_s20, 4  ;;  %s71_s23 = sshll.u32 %s779_s22, 4  ;;  %s58_s21 = int_to_ptr.vmem [resolvable:$true] %s57_s21  ;;  %s72_s23 = int_to_ptr.vmem [resolvable:$true] %s71_s23 }
  0x2e   :  { %s697_s26 = scalar_lea.hbm %s957_s4, 1024 }
  0x2f   :  { %p698_p5 = scmp.ne.s32.totalorder %s957_s4, %s697_s26  ;;  %p701_p6 = scmp.lt.u32.totalorder %s697_s26, %s957_s4 }
  0x31   :  { %p703_p7 = pnand %p701_p6, %p698_p5 }
  0x33   :  { %706 = shalt.err (!%p703_p7)
}
  0x34   :  { %s707_s1 = scalar_lea.vmem %s58_s21, 1024  ;;  %p712_p9 = scmp.lt.s32.totalorder %s58_s21, %s58_s21 }
  0x35   :  { %p708_p8 = scmp.ne.s32.totalorder %s58_s21, %s707_s1  ;;  %p713_p10 = scmp.lt.s32.totalorder %s707_s1, %s707_s1 }
  0x37   :  { %p714_p11 = por %p713_p10, %p712_p9 }
  0x39   :  { %p715_p12 = pnand %p714_p11, %p708_p8 }
  0x3b   :  { %718 = shalt.err (!%p715_p12)
}
  0x3c   :  { %63 = dma.hbm_to_vmem [thread:$0]  %s957_s4, 1024, %s58_s21, [#allocation8], %s775_s17, %s775_s17, %s776_s18  }
  0x3d   :  { %s719_s12 = scalar_lea.hbm %s959_s6, 1024 }
  0x3e   :  { %p720_p13 = scmp.ne.s32.totalorder %s959_s6, %s719_s12  ;;  %p723_p0 = scmp.lt.u32.totalorder %s719_s12, %s959_s6 }
  0x40   :  { %p725_p1 = pnand %p723_p0, %p720_p13 }
  0x42   :  { %728 = shalt.err (!%p725_p1)
}
  0x43   :  { %s729_s0 = scalar_lea.vmem %s72_s23, 1024  ;;  %p734_p3 = scmp.lt.s32.totalorder %s72_s23, %s72_s23 }
  0x44   :  { %p730_p2 = scmp.ne.s32.totalorder %s72_s23, %s729_s0  ;;  %p735_p4 = scmp.lt.s32.totalorder %s729_s0, %s729_s0 }
  0x46   :  { %p736_p5 = por %p735_p4, %p734_p3 }
  0x48   :  { %p737_p6 = pnand %p736_p5, %p730_p2 }
  0x4a   :  { %740 = shalt.err (!%p737_p6)
}
  0x4b   :  { %77 = dma.hbm_to_vmem [thread:$0]  %s959_s6, 1024, %s72_s23, [#allocation11], %s775_s17, %s775_s17, %s776_s18  }
  0x4c   :  { %763 = dma.done.wait [#allocation5], 16  }
  0x4d   :  { %764 = vsyncadd [#allocation5], 4294967280 }
  0x4e   :  { %765 = dma.done.wait [#allocation3], 128  }
  0x4f   :  { %766 = vsyncadd [#allocation3], 4294967168 }
  0x50   :  { %767 = dma.done.wait [#allocation8], 2048  }
  0x51   :  { %768 = vsyncadd [#allocation8], 4294965248 }
  0x52   :  { %769 = dma.done.wait [#allocation11], 1024  }
  0x53   :  { %770 = vsyncadd [#allocation11], 4294966272 }
  0x54   :  { %95 = sfence }
  0x55   :  { %v618_v0 = vld [vmem:[#allocation7] sm:$0xff]   ;;  %v780_v1 = vmov 0.0   ;;  %v619_v2 = vld [vmem:[#allocation7 + $0x8] sm:$0xff]   ;;  %vm781_vm0 = vmmov 0   ;;  %v620_v3 = vld [vmem:[#allocation7 + $0x10] sm:$0xff]   ;;  %s217_s6 = sld [smem:[#allocation2]] }
  0x56   :  { %546 = vmatprep.subr.bf16.mxu0 %v780_v1  ;;  %566 = vmatprep.subr.bf16.mxu1 %v780_v1  ;;  %v627_v4 = vld [vmem:[#allocation9] sm:$0xff]   ;;  %v621_v5 = vld [vmem:[#allocation7 + $0x18] sm:$0xff]   ;;  %v628_v6 = vld [vmem:[#allocation9 + $0x8] sm:$0xff]   ;;  %s518_s22 = sld [smem:[#allocation2 + $0x2]] }
  0x57   :  { %547 = vmatpush3.bf16.msra.mxu0 %v618_v0  ;;  %562 = vmatprep.mubr.msk.bf16.mxu0 %vm781_vm0, %v780_v1  ;;  %v622_v7 = vld [vmem:[#allocation7 + $0x20] sm:$0xff]   ;;  %v629_v8 = vld [vmem:[#allocation9 + $0x10] sm:$0xff]   ;;  %v623_v9 = vld [vmem:[#allocation7 + $0x28] sm:$0xff]  }
  0x58   :  { %548 = vmatprep.subr.bf16.mxu0 %v780_v1  ;;  %582 = vmatprep.mubr.msk.bf16.mxu1 %vm781_vm0, %v780_v1  ;;  %v630_v10 = vld [vmem:[#allocation9 + $0x18] sm:$0xff]   ;;  %v624_v11 = vld [vmem:[#allocation7 + $0x30] sm:$0xff]   ;;  %v631_v12 = vld [vmem:[#allocation9 + $0x20] sm:$0xff]  }
  0x59   :  { %567 = vmatpush3.bf16.msra.mxu1 %v627_v4  ;;  %v625_v13 = vld [vmem:[#allocation7 + $0x38] sm:$0xff]   ;;  %v632_v14 = vld [vmem:[#allocation9 + $0x28] sm:$0xff]   ;;  %v633_v16 = vld [vmem:[#allocation9 + $0x30] sm:$0xff]  }
  0x5a   :  { %568 = vmatprep.subr.bf16.mxu1 %v780_v1  ;;  %v626_v15 = vld [vmem:[#allocation6] sm:$0xff]   ;;  %v635_v18 = vld [vmem:[#allocation10] sm:$0xff]   ;;  %v636_v19 = vld [vmem:[#allocation10 + $0x8] sm:$0xff]  }
  0x5b   :  { %549 = vmatpush3.bf16.msra.mxu0 %v619_v2  ;;  %v634_v17 = vld [vmem:[#allocation9 + $0x38] sm:$0xff]   ;;  %v637_v20 = vld [vmem:[#allocation10 + $0x10] sm:$0xff]   ;;  %v639_v22 = vld [vmem:[#allocation10 + $0x20] sm:$0xff]   ;;  %v220_v26 = vstv %s217_s6 }
  0x5c   :  { %550 = vmatprep.subr.bf16.mxu0 %v780_v1  ;;  %v638_v21 = vld [vmem:[#allocation10 + $0x18] sm:$0xff]   ;;  %v640_v23 = vld [vmem:[#allocation10 + $0x28] sm:$0xff]   ;;  %v641_v37 = vld [vmem:[#allocation10 + $0x30] sm:$0xff]   ;;  %v462_v54 = vstv %s518_s22 }
  0x5d   :  { %569 = vmatpush3.bf16.msra.mxu1 %v628_v6  ;;  %v489_v24 = vld [vmem:[%s956_s3] ss:$0 sm:$0xff]  ;;  %s508_s3 = sld [smem:[#allocation2 + $0x1]] }
  0x5e   :  { %570 = vmatprep.subr.bf16.mxu1 %v780_v1  ;;  %v642_v38 = vld [vmem:[#allocation10 + $0x38] sm:$0xff]  }
  0x5f   :  { %551 = vmatpush3.bf16.msra.mxu0 %v620_v3  ;;  %v499_v39 = vld [vmem:[%s958_s5] ss:$0 sm:$0xff]  ;;  %s782_s5 = smov [#allocation12]  }
  0x60   :  { %552 = vmatprep.subr.bf16.mxu0 %v780_v1  ;;  %v509_v52 = vld [vmem:[%s960_s7] ss:$0 sm:$0xff]  ;;  %s474_s25 = sshll.u32 %s782_s5, 4  ;;  %s475_s25 = int_to_ptr.vmem [resolvable:$true] %s474_s25 }
  0x61   :  { %571 = vmatpush3.bf16.msra.mxu1 %v629_v8  ;;  %s741_s26 = scalar_lea.vmem %s475_s25, 256  ;;  %p746_p8 = scmp.lt.s32.totalorder %s475_s25, %s475_s25 }
  0x62   :  { %572 = vmatprep.subr.bf16.mxu1 %v780_v1  ;;  %p742_p7 = scmp.ne.s32.totalorder %s475_s25, %s741_s26  ;;  %p747_p9 = scmp.lt.s32.totalorder %s741_s26, %s741_s26 }
  0x63   :  { %553 = vmatpush3.bf16.msra.mxu0 %v621_v5  ;;  %v341_v41 = vstv %s508_s3 }
  0x64   :  { %554 = vmatprep.subr.bf16.mxu0 %v780_v1  ;;  %p748_p10 = por %p747_p9, %p746_p8 }
  0x65   :  { %573 = vmatpush3.bf16.msra.mxu1 %v630_v10 }
  0x66   :  { %574 = vmatprep.subr.bf16.mxu1 %v780_v1  ;;  %p749_p11 = pnand %p748_p10, %p742_p7 }
  0x67   :  { %555 = vmatpush3.bf16.msra.mxu0 %v622_v7 }
  0x68   :  { %556 = vmatprep.subr.bf16.mxu0 %v780_v1 }
  0x69   :  { %575 = vmatpush3.bf16.msra.mxu1 %v631_v12 }
  0x6a   :  { %576 = vmatprep.subr.bf16.mxu1 %v780_v1 }
  0x6b   :  { %557 = vmatpush3.bf16.msra.mxu0 %v623_v9 }
  0x6c   :  { %558 = vmatprep.subr.bf16.mxu0 %v780_v1 }
  0x6d   :  { %577 = vmatpush3.bf16.msra.mxu1 %v632_v14 }
  0x6e   :  { %578 = vmatprep.subr.bf16.mxu1 %v780_v1 }
  0x6f   :  { %559 = vmatpush3.bf16.msra.mxu0 %v624_v11 }
  0x70   :  { %560 = vmatprep.subr.bf16.mxu0 %v780_v1 }
  0x71   :  { %579 = vmatpush3.bf16.msra.mxu1 %v633_v16 }
  0x72   :  { %580 = vmatprep.subr.bf16.mxu1 %v780_v1 }
  0x73   :  { %561 = vmatpush3.bf16.msra.mxu0 %v625_v13 }
  0x74   :  { %586 = vmatprep.subr.bf16.mxu0 %v780_v1 }
  0x75   :  { %581 = vmatpush3.bf16.msra.mxu1 %v634_v17 }
  0x76   :  { %563 = vmatmul.mubr.bf16.vlgmr.msra.gmra.mrb[0].mxu0 %v626_v15 }
  0x77   :  { %602 = vmatprep.mubr.msk.bf16.mxu0 %vm781_vm0, %v780_v1  ;;  %587 = vmatpush3.bf16.msra.mxu0 %v635_v18 }
  0x78   :  { %588 = vmatprep.subr.bf16.mxu0 %v780_v1 }
  0x7b   :  { %589 = vmatpush3.bf16.msra.mxu0 %v636_v19 }
  0x7c   :  { %590 = vmatprep.subr.bf16.mxu0 %v780_v1 }
  0x7f   :  { %591 = vmatpush3.bf16.msra.mxu0 %v637_v20 }
  0x80   :  { %592 = vmatprep.subr.bf16.mxu0 %v780_v1 }
  0x83   :  { %593 = vmatpush3.bf16.msra.mxu0 %v638_v21 }
  0x84   :  { %594 = vmatprep.subr.bf16.mxu0 %v780_v1 }
  0x87   :  { %595 = vmatpush3.bf16.msra.mxu0 %v639_v22 }
  0x88   :  { %596 = vmatprep.subr.bf16.mxu0 %v780_v1 }
  0x8b   :  { %597 = vmatpush3.bf16.msra.mxu0 %v640_v23 }
  0x8c   :  { %598 = vmatprep.subr.bf16.mxu0 %v780_v1 }
  0x8f   :  { %599 = vmatpush3.bf16.msra.mxu0 %v641_v37 }
  0x90   :  { %600 = vmatprep.subr.bf16.mxu0 %v780_v1 }
  0x93   :  { %601 = vmatpush3.bf16.msra.mxu0 %v642_v38 }
 0x149   :  { %v210_v25 = vpop.f32.mrb[0].mxu0 }
 0x14a   :  { %v211_v27 = vadd.f32 %v489_v24, %v210_v25  ;;  %v564_v28 = vpop.f32.mrb[1].mxu0 }
 0x14b   :  { %v213_v29 = vpop.f32.mrb[2].mxu0 }
 0x14c   :  { %v221_v30 = vmul.f32 %v220_v26, %v211_v27  ;;  %v214_v31 = vadd.f32 %v489_v24, %v213_v29  ;;  %v565_v32 = vpop.f32.mrb[3].mxu0  ;;  %vm218_vm1 = vcmp.gt.f32.partialorder %v211_v27, 0.0 }
 0x14e   :  { %vm219_vm2 = vcmp.gt.f32.partialorder %v214_v31, 0.0  ;;  %v222_v33 = vmul.f32 %v220_v26, %v214_v31  ;;  %v223_v34 = vsel %vm218_vm1, %v211_v27, %v221_v30 }
 0x150   :  { %v224_v35 = vsel %vm219_vm2, %v214_v31, %v222_v33 }
 0x151   :  { %v225_v36 = vpack.c.bf16 %v224_v35, %v223_v34 }
 0x153   :  { %583 = vmatmul.mubr.bf16.vlgmr.msra.gmra.mrb[0].mxu1 %v225_v36 }
 0x226   :  { %v331_v40 = vpop.f32.mrb[0].mxu1 }
 0x227   :  { %v332_v42 = vadd.f32 %v499_v39, %v331_v40  ;;  %v584_v43 = vpop.f32.mrb[1].mxu1 }
 0x228   :  { %v334_v44 = vpop.f32.mrb[2].mxu1 }
 0x229   :  { %v342_v45 = vmul.f32 %v341_v41, %v332_v42  ;;  %v335_v46 = vadd.f32 %v499_v39, %v334_v44  ;;  %v585_v47 = vpop.f32.mrb[3].mxu1  ;;  %vm339_vm3 = vcmp.gt.f32.partialorder %v332_v42, 0.0 }
 0x22b   :  { %vm340_vm4 = vcmp.gt.f32.partialorder %v335_v46, 0.0  ;;  %v343_v48 = vmul.f32 %v341_v41, %v335_v46  ;;  %v344_v49 = vsel %vm339_vm3, %v332_v42, %v342_v45 }
 0x22d   :  { %v345_v50 = vsel %vm340_vm4, %v335_v46, %v343_v48 }
 0x22e   :  { %v346_v51 = vpack.c.bf16 %v345_v50, %v344_v49 }
 0x230   :  { %603 = vmatmul.mubr.bf16.vlgmr.msra.gmra.mrb[4].mxu0 %v346_v51 }
 0x303   :  { %v452_v53 = vpop.f32.mrb[4].mxu0 }
 0x304   :  { %v453_v55 = vadd.f32 %v509_v52, %v452_v53  ;;  %v604_v56 = vpop.f32.mrb[5].mxu0 }
 0x305   :  { %v455_v57 = vpop.f32.mrb[6].mxu0 }
 0x306   :  { %vm460_vm5 = vcmp.gt.f32.partialorder %v453_v55, 0.0  ;;  %v463_v58 = vmul.f32 %v462_v54, %v453_v55  ;;  %v456_v59 = vadd.f32 %v509_v52, %v455_v57  ;;  %v605_v60 = vpop.f32.mrb[7].mxu0 }
 0x308   :  { %v465_v61 = vsel %vm460_vm5, %v453_v55, %v463_v58  ;;  %vm461_vm6 = vcmp.gt.f32.partialorder %v456_v59, 0.0  ;;  %v464_v62 = vmul.f32 %v462_v54, %v456_v59 }
 0x309   :  { %467 = vst [vmem:[#allocation12] sm:$0xff] %v465_v61 }
 0x30a   :  { %v466_v63 = vsel %vm461_vm6, %v456_v59, %v464_v62 }
 0x30b   :  { %468 = vst [vmem:[#allocation12 + $0x8] sm:$0xff] %v466_v63 }
 0x30c   :  { %752 = shalt.err (!%p749_p11)
}
 0x30d   :  { %s753_s29 = scalar_lea.hbm %s961_s8, 256 }
 0x30e   :  { %p754_p12 = scmp.ne.s32.totalorder %s961_s8, %s753_s29  ;;  %p757_p13 = scmp.lt.u32.totalorder %s753_s29, %s961_s8 }
 0x310   :  { %p759_p0 = pnand %p757_p13, %p754_p12 }
 0x312   :  { %762 = shalt.err (!%p759_p0)
}
 0x313   :  { %s783_s2 = smov 128   ;;  %s784_s28 = smov 8  }
 0x314   :  { %480 = dma.vmem_to_hbm [thread:$0]  %s475_s25, 256, %s961_s8, [#allocation4], %s783_s2, %s783_s2, %s784_s28  }
 0x315   :  { %771 = dma.done.wait [#allocation4], 256  }
 0x316   :  { %772 = vsyncadd [#allocation4], 4294967040 }
 0x317   :  { %484 = vsyncpa [#allocation3], 1 }
 0x318   :  { %485 = vsyncpa [#allocation8], 1 }
 0x319   :  { %486 = vsyncpa [#allocation11], 1 }
 0x31a   :  { %487 = vsyncpa [#allocation4], 1 }
 0x31b   :  { %488 = vsyncpa [#allocation5], 1 }

</bundles_post_ra>
